<compile_context>
chip_gen: v6e
topology: v6e:2x2x1
jax: 0.10.0
libtpu: 0.0.40
codegen_flags: <defaults>
</compile_context>

<pallas_src>
import functools
import math

import jax
import jax.numpy as jnp
from jax import lax
from jax.experimental import pallas as pl
from jax.experimental.pallas import tpu as pltpu


def _round_up(v, m):
    return (v + m - 1) // m * m


def _attn_kernel(x_ref, mrow_ref, mcol_ref, wqkv_ref, bqkv_ref, o_ref,
                 *, inv_sqrt_d, dp):
    # x_ref    : (N, H)      mrow_ref : (N, 1)     mcol_ref : (1, N)
    # wqkv_ref : (H, 3*Dp)   bqkv_ref : (1, 3*Dp)  o_ref    : (N, Dp)
    x = x_ref[...]

    # Fused Q/K/V projection: a single wide MXU matmul, bias added once.
    qkv = (jnp.dot(x, wqkv_ref[...], preferred_element_type=jnp.float32)
           + bqkv_ref[...])                                     # (N, 3*Dp)
    q = qkv[:, 0 * dp:1 * dp] * inv_sqrt_d   # fold 1/sqrt(D) into Q (O(N*D))
    k = qkv[:, 1 * dp:2 * dp]
    v = qkv[:, 2 * dp:3 * dp]

    # Att[i, j] = <Q_i, K_j>; contract last dims so K is consumed untransposed.
    att = lax.dot_general(q, k, (((1,), (1,)), ((), ())),
                          preferred_element_type=jnp.float32)   # (N, N)

    # Additive column mask.  The reference's Q*m, K*m, V*m multiplies are
    # mathematically redundant here: masked columns get softmax weight exactly
    # 0 via the -1e9 bias (exp underflows), and masked rows are zeroed by the
    # final * m_row — so the three O(N*D) VPU multiplies are skipped.
    att = att + (mcol_ref[...] - 1.0) * 1e9                     # (N, N)

    # Numerically-stable softmax over the last axis.
    att = att - jnp.max(att, axis=-1, keepdims=True)
    p = jnp.exp(att)
    denom = jnp.sum(p, axis=-1, keepdims=True)
    att = p * pl.reciprocal(denom, approx=True)

    # TODO(synk): dropout (drop=0.0 in this config) is omitted — identity.

    out = jnp.dot(att, v, preferred_element_type=jnp.float32) * mrow_ref[...]
    o_ref[...] = out.astype(o_ref.dtype)


def _vmem_limit_bytes(N, H, Dp):
    f32 = 4
    # double-buffered pipeline operands (rounded generously to vreg tiles)
    buffered = 2 * (N * H + N * 128 + 8 * N + H * 3 * Dp + 8 * 3 * Dp + N * Dp)
    # in-kernel temporaries: qkv, q/k/v views, att/p and slack
    temps = N * 3 * Dp + 3 * N * Dp + 4 * N * max(N, 128)
    needed = f32 * (buffered + temps)
    return int(min(max(needed * 2, 32 * 1024 * 1024), 64 * 1024 * 1024))


def attention_node_to_node_dense(x, e, node_mask, params, head_dim):
    """
    x         : (B, N, hidden_dim) float32
    e         : any array, passed through unchanged
    node_mask : (B, N) float32 (0/1)
    params    : dict with Wq, bq, Wk, bk, Wv, bv
                W* shape (hidden_dim, head_dim), b* shape (head_dim,)
    returns (x_out, e) with x_out shape (B, N, head_dim)
    """
    B, N, H = x.shape
    D = head_dim
    Dp = _round_up(D, 128)          # lane-dense padded head dim

    def pad_w(w):                   # (H, D) -> (H, Dp), zero padded
        return jnp.pad(w, ((0, 0), (0, Dp - D))) if Dp != D else w

    def pad_b(b):                   # (D,) -> (Dp,), zero padded
        return jnp.pad(b, ((0, Dp - D),)) if Dp != D else b

    # Fused (and zero-padded) projection weight / bias.
    wqkv = jnp.concatenate(
        [pad_w(params["Wq"]), pad_w(params["Wk"]), pad_w(params["Wv"])],
        axis=1).astype(jnp.float32)                         # (H, 3*Dp)
    bqkv = jnp.concatenate(
        [pad_b(params["bq"]), pad_b(params["bk"]), pad_b(params["bv"])]
    ).reshape(1, 3 * Dp).astype(jnp.float32)                # (1, 3*Dp)

    m = node_mask.astype(jnp.float32)
    mrow = m.reshape(B, N, 1)
    mcol = m.reshape(B, 1, N)

    kernel = functools.partial(_attn_kernel,
                               inv_sqrt_d=1.0 / math.sqrt(float(D)), dp=Dp)

    flops = B * (2 * N * H * 3 * Dp + 4 * N * N * Dp)
    transcendentals = B * (N * N + N)
    bytes_accessed = 4 * (B * N * H + 2 * B * N + H * 3 * Dp + 3 * Dp
                          + B * N * Dp)
    cost = pl.CostEstimate(flops=flops, transcendentals=transcendentals,
                           bytes_accessed=bytes_accessed)

    const = lambda b: (0, 0)        # index map for un-tiled weight/bias blocks

    out = pl.pallas_call(
        kernel,
        out_shape=jax.ShapeDtypeStruct((B, N, Dp), jnp.float32),
        grid_spec=pltpu.PrefetchScalarGridSpec(
            num_scalar_prefetch=0,
            grid=(B,),
            in_specs=[
                pl.BlockSpec((None, N, H), lambda b: (b, 0, 0)),   # x
                pl.BlockSpec((None, N, 1), lambda b: (b, 0, 0)),   # row mask
                pl.BlockSpec((None, 1, N), lambda b: (b, 0, 0)),   # col mask
                pl.BlockSpec((H, 3 * Dp), const),                   # Wqkv
                pl.BlockSpec((1, 3 * Dp), const),                   # bqkv
            ],
            out_specs=pl.BlockSpec((None, N, Dp), lambda b: (b, 0, 0)),
        ),
        compiler_params=pltpu.CompilerParams(
            dimension_semantics=("parallel",),
            vmem_limit_bytes=_vmem_limit_bytes(N, H, Dp)),
        cost_estimate=cost,
    )(x, mrow, mcol, wqkv, bqkv)

    if Dp != D:
        out = out[..., :D]
    return out, e


def _reference(x, e, node_mask, params, head_dim):
    """Plain-JAX reference mirroring the PyTorch forward."""
    m = node_mask[..., None].astype(jnp.float32)
    Q = (x @ params["Wq"] + params["bq"]) * m
    K = (x @ params["Wk"] + params["bk"]) * m
    V = (x @ params["Wv"] + params["bv"]) * m
    att = jnp.einsum("bid,bjd->bij", Q, K) / jnp.sqrt(jnp.float32(head_dim))
    am = (node_mask[:, None, :] * node_mask[:, :, None]) > 0
    att = jnp.where(am, att, -1e9)
    att = jax.nn.softmax(att, axis=-1)
    out = jnp.einsum("bij,bjd->bid", att, V) * m
    return out, e


if __name__ == "__main__":
    B, N, hidden_dim, head_dim = 2, 8, 32, 32

    key = jax.random.PRNGKey(0)
    k_x, k_wq, k_bq, k_wk, k_bk, k_wv, k_bv, k_m = jax.random.split(key, 8)

    x = jax.random.normal(k_x, (B, N, hidden_dim), dtype=jnp.float32)
    e = jax.random.normal(k_m, (B, N, N, 4), dtype=jnp.float32)

    # node_mask: first few nodes active, rest padded (deterministic)
    node_mask = jnp.concatenate(
        [jnp.ones((B, N - 2), jnp.float32), jnp.zeros((B, 2), jnp.float32)],
        axis=-1)

    lim = 1.0 / math.sqrt(hidden_dim)  # PyTorch Linear default init range
    params = {
        "Wq": jax.random.uniform(k_wq, (hidden_dim, head_dim), jnp.float32, -lim, lim),
        "bq": jax.random.uniform(k_bq, (head_dim,), jnp.float32, -lim, lim),
        "Wk": jax.random.uniform(k_wk, (hidden_dim, head_dim), jnp.float32, -lim, lim),
        "bk": jax.random.uniform(k_bk, (head_dim,), jnp.float32, -lim, lim),
        "Wv": jax.random.uniform(k_wv, (hidden_dim, head_dim), jnp.float32, -lim, lim),
        "bv": jax.random.uniform(k_bv, (head_dim,), jnp.float32, -lim, lim),
    }

    out, e_out = attention_node_to_node_dense(x, e, node_mask, params, head_dim)
    out = jax.block_until_ready(out)

    ref_out, _ = _reference(x, e, node_mask, params, head_dim)
    # Tolerance slightly relaxed vs pure-f32 to cover the approx (EUP vrcp)
    # softmax reciprocal; all other math stays in f32.
    assert jnp.allclose(out, ref_out, atol=5e-4, rtol=5e-3), "mismatch vs reference"
    assert (e_out == e).all()

    print("KERNEL_OK")
</pallas_src>

<mosaic_0001>
module attributes {stable_mosaic.version = 11 : i64} {
  func.func @_attn_kernel(%arg0: i32, %arg1: memref<1x8x32xf32, #tpu.memory_space<vmem>>, %arg2: memref<1x8x1xf32, #tpu.memory_space<vmem>>, %arg3: memref<1x1x8xf32, #tpu.memory_space<vmem>>, %arg4: memref<32x384xf32, #tpu.memory_space<vmem>>, %arg5: memref<1x384xf32, #tpu.memory_space<vmem>>, %arg6: memref<1x8x128xf32, #tpu.memory_space<vmem>>) attributes {dimension_semantics = [#tpu.dimension_semantics<parallel>], iteration_bounds = array<i64: 2>, scalar_prefetch = 0 : i64, scratch_operands = 0 : i64, tpu.core_type = #tpu.core_type<tc>, window_params = [{transform_indices = @transform_0, window_bounds = array<i64: 1, 8, 32>}, {transform_indices = @transform_1, window_bounds = array<i64: 1, 8, 1>}, {transform_indices = @transform_2, window_bounds = array<i64: 1, 1, 8>}, {pipeline_mode = #tpu.pipeline_mode<synchronous>, transform_indices = @transform_3, window_bounds = array<i64: 32, 384>}, {pipeline_mode = #tpu.pipeline_mode<synchronous>, transform_indices = @transform_4, window_bounds = array<i64: 1, 384>}, {transform_indices = @transform_5, window_bounds = array<i64: 1, 8, 128>}]} {
    %c0 = arith.constant 0 : index
    %c0_0 = arith.constant 0 : index
    %c0_1 = arith.constant 0 : index
    %0 = vector.load %arg1[%c0, %c0_0, %c0_1] : memref<1x8x32xf32, #tpu.memory_space<vmem>>, vector<1x8x32xf32>
    %1 = vector.shape_cast %0 : vector<1x8x32xf32> to vector<8x32xf32>
    %c0_2 = arith.constant 0 : index
    %c0_3 = arith.constant 0 : index
    %2 = vector.load %arg4[%c0_2, %c0_3] : memref<32x384xf32, #tpu.memory_space<vmem>>, vector<32x384xf32>
    %cst = arith.constant dense<0.000000e+00> : vector<8x384xf32>
    %3 = tpu.matmul %1, %2, %cst {dimension_numbers = #tpu.dot_dimension_numbers<[1], [0], [0], [1], [0, 0, 1, 1], [], []>} : vector<8x32xf32>, vector<32x384xf32>, vector<8x384xf32> -> vector<8x384xf32>
    %c0_4 = arith.constant 0 : index
    %c0_5 = arith.constant 0 : index
    %4 = vector.load %arg5[%c0_4, %c0_5] : memref<1x384xf32, #tpu.memory_space<vmem>>, vector<1x384xf32>
    %5 = vector.broadcast %4 : vector<1x384xf32> to vector<8x384xf32>
    %6 = arith.addf %3, %5 : vector<8x384xf32>
    %7 = vector.extract_strided_slice %6 {offsets = [0, 0], sizes = [8, 128], strides = [1, 1]} : vector<8x384xf32> to vector<8x128xf32>
    %cst_6 = arith.constant 0.176776692 : f32
    %8 = vector.broadcast %cst_6 : f32 to vector<8x128xf32>
    %9 = arith.mulf %7, %8 : vector<8x128xf32>
    %10 = vector.extract_strided_slice %6 {offsets = [0, 128], sizes = [8, 128], strides = [1, 1]} : vector<8x384xf32> to vector<8x128xf32>
    %11 = vector.extract_strided_slice %6 {offsets = [0, 256], sizes = [8, 128], strides = [1, 1]} : vector<8x384xf32> to vector<8x128xf32>
    %cst_7 = arith.constant dense<0.000000e+00> : vector<8x8xf32>
    %12 = tpu.matmul %9, %10, %cst_7 {dimension_numbers = #tpu.dot_dimension_numbers<[1], [1], [0], [0], [0, 0, 1, 0], [], []>} : vector<8x128xf32>, vector<8x128xf32>, vector<8x8xf32> -> vector<8x8xf32>
    %c0_8 = arith.constant 0 : index
    %c0_9 = arith.constant 0 : index
    %c0_10 = arith.constant 0 : index
    %13 = vector.load %arg3[%c0_8, %c0_9, %c0_10] : memref<1x1x8xf32, #tpu.memory_space<vmem>>, vector<1x1x8xf32>
    %14 = vector.shape_cast %13 : vector<1x1x8xf32> to vector<1x8xf32>
    %cst_11 = arith.constant 1.000000e+00 : f32
    %15 = vector.broadcast %cst_11 : f32 to vector<1x8xf32>
    %16 = arith.subf %14, %15 : vector<1x8xf32>
    %cst_12 = arith.constant 1.000000e+09 : f32
    %17 = vector.broadcast %cst_12 : f32 to vector<1x8xf32>
    %18 = arith.mulf %16, %17 : vector<1x8xf32>
    %19 = vector.broadcast %18 : vector<1x8xf32> to vector<8x8xf32>
    %20 = arith.addf %12, %19 : vector<8x8xf32>
    %cst_13 = arith.constant dense<0xFF800000> : vector<8xf32>
    %21 = vector.multi_reduction <maximumf>, %20, %cst_13 [1] : vector<8x8xf32> to vector<8xf32>
    %22 = vector.shape_cast %21 : vector<8xf32> to vector<8x1xf32>
    %23 = vector.broadcast %22 : vector<8x1xf32> to vector<8x8xf32>
    %24 = arith.subf %20, %23 : vector<8x8xf32>
    %25 = math.exp %24 : vector<8x8xf32>
    %cst_14 = arith.constant dense<0.000000e+00> : vector<8xf32>
    %26 = vector.multi_reduction <add>, %25, %cst_14 [1] : vector<8x8xf32> to vector<8xf32>
    %27 = vector.shape_cast %26 : vector<8xf32> to vector<8x1xf32>
    %28 = tpu.reciprocal %27 {approx = true} : vector<8x1xf32> -> vector<8x1xf32>
    %29 = vector.broadcast %28 : vector<8x1xf32> to vector<8x8xf32>
    %30 = arith.mulf %25, %29 : vector<8x8xf32>
    %cst_15 = arith.constant dense<0.000000e+00> : vector<8x128xf32>
    %31 = tpu.matmul %30, %11, %cst_15 {dimension_numbers = #tpu.dot_dimension_numbers<[1], [0], [0], [1], [0, 0, 1, 1], [], []>} : vector<8x8xf32>, vector<8x128xf32>, vector<8x128xf32> -> vector<8x128xf32>
    %c0_16 = arith.constant 0 : index
    %c0_17 = arith.constant 0 : index
    %c0_18 = arith.constant 0 : index
    %32 = vector.load %arg2[%c0_16, %c0_17, %c0_18] : memref<1x8x1xf32, #tpu.memory_space<vmem>>, vector<1x8x1xf32>
    %33 = vector.shape_cast %32 : vector<1x8x1xf32> to vector<8x1xf32>
    %34 = vector.broadcast %33 : vector<8x1xf32> to vector<8x128xf32>
    %35 = arith.mulf %31, %34 : vector<8x128xf32>
    %c0_19 = arith.constant 0 : index
    %c0_20 = arith.constant 0 : index
    %c0_21 = arith.constant 0 : index
    %36 = vector.load %arg6[%c0_19, %c0_20, %c0_21] : memref<1x8x128xf32, #tpu.memory_space<vmem>>, vector<1x8x128xf32>
    %37 = vector.shape_cast %36 : vector<1x8x128xf32> to vector<8x128xf32>
    %38 = vector.shape_cast %35 : vector<8x128xf32> to vector<1x8x128xf32>
    tpu.vector_store %arg6[%c0_19, %c0_20, %c0_21], %38 {strides = array<i32>} : memref<1x8x128xf32, #tpu.memory_space<vmem>>, vector<1x8x128xf32>,
    return
  }
  func.func @transform_0(%arg0: i32) -> (i32, i32, i32) {
    %c0_i32 = arith.constant 0 : i32
    %c0_i32_0 = arith.constant 0 : i32
    %c0_i32_1 = arith.constant 0 : i32
    return %arg0, %c0_i32, %c0_i32_0 : i32, i32, i32
  }
  func.func @transform_1(%arg0: i32) -> (i32, i32, i32) {
    %c0_i32 = arith.constant 0 : i32
    %c0_i32_0 = arith.constant 0 : i32
    %c0_i32_1 = arith.constant 0 : i32
    return %arg0, %c0_i32, %c0_i32_0 : i32, i32, i32
  }
  func.func @transform_2(%arg0: i32) -> (i32, i32, i32) {
    %c0_i32 = arith.constant 0 : i32
    %c0_i32_0 = arith.constant 0 : i32
    %c0_i32_1 = arith.constant 0 : i32
    return %arg0, %c0_i32, %c0_i32_0 : i32, i32, i32
  }
  func.func @transform_3(%arg0: i32) -> (i32, i32) {
    %c0_i32 = arith.constant 0 : i32
    %c0_i32_0 = arith.constant 0 : i32
    %c0_i32_1 = arith.constant 0 : i32
    return %c0_i32, %c0_i32_0 : i32, i32
  }
  func.func @transform_4(%arg0: i32) -> (i32, i32) {
    %c0_i32 = arith.constant 0 : i32
    %c0_i32_0 = arith.constant 0 : i32
    %c0_i32_1 = arith.constant 0 : i32
    return %c0_i32, %c0_i32_0 : i32, i32
  }
  func.func @transform_5(%arg0: i32) -> (i32, i32, i32) {
    %c0_i32 = arith.constant 0 : i32
    %c0_i32_0 = arith.constant 0 : i32
    %c0_i32_1 = arith.constant 0 : i32
    return %arg0, %c0_i32, %c0_i32_0 : i32, i32, i32
  }
}

</mosaic_0001>

<bundles_post_ra>
// kernel: tpu_custom_call.1
= control target key start
LH: loop header
LB: loop body
LE: loop exit
PB: predicated region body
PF: predicated region fallthrough
CT: control target
= control target key end

     0   :  { %10 = vsyncpa [#allocation3], 0  ;;  %s1093_s0 = inlined_call_operand.vmem [shape: f32[2,8,32], index: 0, kind: input, shape index: {}]   ;;  %s1094_s1 = inlined_call_operand.vmem [shape: f32[2,8,1], index: 1, kind: input, shape index: {}]   ;;  %s1095_s2 = inlined_call_operand.vmem [shape: f32[2,1,8], index: 2, kind: input, shape index: {}]   ;;  %s1096_s3 = inlined_call_operand.hbm [shape: f32[32,384], index: 3, kind: input, shape index: {}]   ;;  %s1097_s4 = inlined_call_operand.vmem [shape: f32[1,384], index: 4, kind: input, shape index: {}]   ;;  %s1098_s5 = inlined_call_operand.hbm [shape: f32[2,8,128], index: 5, kind: output, shape index: {}]  }
   0x1   :  { %11 = vsyncpa [#allocation4], 0 }
   0x2   :  { %13 = vsyncpa [#allocation4 + $0x1], 0  ;;  %s957_s18 = smov 0   ;;  %s959_s19 = smov 0  }
   0x3   :  { %s961_s20 = smov 0   ;;  %s963_s21 = smov 0  }
   0x4 LB: > { %s978_s22 = sadd.s32 4294967295, %s918_s21   ;;  %s720_s23 = sadd.s32 4294967294, %s918_s21   ;;  %s918_s21 = sphi %s963_s21, %s1106_s21   ;;  %s914_s20 = sphi %s961_s20, %s1105_s20   ;;  %s910_s19 = sphi %s959_s19, %s1104_s19   ;;  %s906_s18 = sphi %s957_s18, %s1103_s18  }
   0x5   : > { %s982_s24 = sadd.s32 1, %s918_s21   ;;  %s146_s25 = sadd.s32 1, %s914_s20 }
   0x6   : > { %s143_s26 = ssub.s32 %s918_s21, %s982_s24  ;;  %p156_p0 = scmp.ne.s32.totalorder %s914_s20, %s910_s19 }
   0x7   : > { %p144_p1 = scmp.eq.s32.totalorder %s143_s26, 0  ;;  %p157_p2 = scmp.eq.s32.totalorder %s978_s22, 1 }
   0x8   : > { %p162_p3 = scmp.ne.s32.totalorder %s910_s19, %s906_s18  ;;  %p163_p4 = scmp.eq.s32.totalorder %s720_s23, 1 }
   0x9   : > { %s993_s27 = scalar_select %p144_p1, %s914_s20, %s146_s25  }
   0xa   : > { %p995_p5 = por %p157_p2, %p156_p0  ;;  %p999_p6 = por %p163_p4, %p162_p3 }
   0xb   : > { %p721_p7 = scmp.ge.s32.totalorder %s918_s21, 1  ;;  %p170_p8 = scmp.lt.s32.totalorder %s918_s21, 3 }
   0xc   : > { %s1100_s29 = scalar_select %p999_p6, 1, 0 }
   0xd   : > { %p781_p9 = scmp.eq.s32.totalorder %s978_s22, 0  ;;  %p1006_p10 = pnand %p721_p7, %p170_p8 }
   0xe   : > { %s920_s6 = smov [#allocation2]  }
   0xf   : > { %s182_s7 = sshll.u32 %s920_s6, 4  ;;  %p773_p11 = pneg %p1006_p10  ;;  %s183_s7 = int_to_ptr.vmem [resolvable:$true] %s182_s7 }
  0x10   : > { %s839_s8 = scalar_lea.vmem %s183_s7, 1536  ;;  %p847_p3 = scmp.lt.s32.totalorder %s183_s7, %s183_s7 }
  0x11   : > { %p774_p12 = pnand %p781_p9, %p773_p11  ;;  %p840_p0 = scmp.ne.s32.totalorder %s183_s7, %s839_s8 }
  0x12   : > { %p848_p4 = scmp.lt.s32.totalorder %s839_s8, %s839_s8 }
  0x13   : > { %p830_p13 = pneg %p774_p12 }
  0x14   : > { %p849_p6 = por %p848_p4, %p847_p3 }
  0x15   : > { %p842_p1 = pnand %p840_p0, %p830_p13 }
  0x17   : > { %p843_p2 = pneg %p842_p1 }
  0x19   : > { %p850_p7 = pnand %p849_p6, %p843_p2 }
  0x1b   : > { %853 = shalt.err (!%p850_p7)
}
  0x1c   : > { %s921_s9 = smov 384   ;;  %s922_s10 = smov 24  }
  0x1d   : > { %776 = dma.hbm_to_vmem [thread:$0]  (!%p774_p12), %s1096_s3, 1536, %s183_s7, [#allocation3], %s921_s9, %s921_s9, %s922_s10  }
  0x1e   : > { %221 = sbr.rel (%p1006_p10) target bundleno = 961 (0x3c1), region = 40 }
  0x23   : > { %897 = dma.done.wait (%p781_p9), [#allocation3], 1536  }
  0x24   : > { %899 = vsyncadd (%p781_p9), [#allocation3], 4294965760  ;;  %p255_p8 = scmp.lt.s32.totalorder %s978_s22, 1  ;;  %v923_v0 = vmov 0.0   ;;  %v277_v1 = vld [vmem:[#allocation2 + $0x50] sm:$0xff]  ;;  %v276_v2 = vld [vmem:[#allocation2 + $0x48] sm:$0xff]  ;;  %v281_v10 = vlaneseq }
  0x25   : > { %364 = vmatprep.mubr.f32.mxu0 %v923_v0  ;;  %746 = vmatprep.subr.mxu1 %v923_v0  ;;  %v274_v3 = vld [vmem:[#allocation2 + $0x38] sm:$0xff]  ;;  %v273_v4 = vld [vmem:[#allocation2 + $0x30] sm:$0xff]  ;;  %v271_v5 = vld [vmem:[#allocation2 + $0x20] sm:$0xff]  ;;  %vm296_vm0 = vcmask 261120   ;;  %vm924_vm1 = vmmov 0   ;;  %vm521_vm2 = vcmask 64512  }
  0x26   : > { %s1025_s13 = scalar_select %p255_p8, %s978_s22, 1  ;;  %324 = vmatprep.subr.mxu0 %v277_v1  ;;  %v270_v6 = vld [vmem:[#allocation2 + $0x18] sm:$0xff]  ;;  %v268_v7 = vld [vmem:[#allocation2 + $0x8] sm:$0xff]  ;;  %v267_v8 = vld [vmem:[#allocation2] sm:$0xff]  ;;  %754 = vmatprep.mubr.msk.f32.mxu1 %vm924_vm1, %v923_v0  ;;  %v282_v11 = vshrl.u32 %v281_v10, 7  ;;  %v925_v44 = vmov 0  }
  0x27   : > { %325 = vmatpush1.msra.mxu0 %v276_v2  ;;  %v279_v13 = vld [vmem:[%s1097_s4] sm:$0x7]  ;;  %v278_v22 = vld [vmem:[#allocation2 + $0x58] sm:$0xff]  ;;  %v272_v24 = vld [vmem:[#allocation2 + $0x28] sm:$0xff]  ;;  %822 = vset.pattern.permute.xlu1 %v925_v44  ;;  %s252_s10 = sand.u32 1, %s910_s19   ;;  %s734_s12 = sshll.u32 %s978_s22, 7 }
  0x28   : > { %s727_s14 = sshll.u32 %s1025_s13, 3  ;;  %326 = vmatprep.subr.mxu0 %v274_v3  ;;  %v283_v12 = vsub.s32 0, %v282_v11  ;;  %v287_v14 = vsub.s32 1, %v282_v11  ;;  %v275_v23 = vld [vmem:[#allocation2 + $0x40] sm:$0xff]  ;;  %747 = vmatpush3.msra.mxu1 %v278_v22  ;;  %v269_v25 = vld [vmem:[#allocation2 + $0x10] sm:$0xff]  ;;  %s265_s6 = scalar_lea.vmem %s1095_s2, %s1025_s13  ;;  %v291_v39 = vsub.s32 2, %v282_v11 }
  0x29   : > { %s258_s17 = scalar_lea.vmem %s1093_s0, %s727_s14  ;;  %327 = vmatpush1.msra.mxu0 %v273_v4  ;;  %748 = vmatprep.subr.mxu1 %v923_v0  ;;  %v442_v26 = vld [vmem:[%s265_s6] sm:$0x1]  ;;  %s262_s9 = scalar_lea.vmem %s1094_s1, %s727_s14 }
  0x2a   : > { %328 = vmatprep.subr.mxu0 %v271_v5  ;;  %v266_v9 = vld [vmem:[%s258_s17] sm:$0xff]  ;;  %v284_v15 = vrot.slane %v279_v13, %v283_v12  ;;  %v288_v16 = vrot.slane %v279_v13, %v287_v14  ;;  %749 = vmatpush3.msra.mxu1 %v275_v23  ;;  %v731_v27 = vadd.f32 -1.0, %v442_v26  ;;  %v292_v41 = vrot.slane %v279_v13, %v291_v39  ;;  %s726_s11 = sshll.u32 %s252_s10, 3  ;;  %s1058_s17 = scalar_lea.hbm %s1098_s5, %s734_s12 }
  0x2b   : > { %329 = vmatpush1.msra.mxu0 %v270_v6  ;;  %750 = vmatprep.subr.mxu1 %v923_v0  ;;  %v606_v45 = vld [vmem:[%s262_s9] sm:$0xff]  ;;  %s254_s13 = scalar_lea.vmem [#allocation5], %s726_s11  ;;  %s615_s23 = scalar_lea.sflag [#allocation4], %s252_s10 }
  0x2c   : > { %330 = vmatprep.subr.mxu0 %v268_v7  ;;  %751 = vmatpush3.msra.mxu1 %v272_v24  ;;  %v444_v28 = vmul.f32 1e+09, %v731_v27  ;;  %s628_s15 = sshll.u32 %s254_s13, 4  ;;  %s926_s26 = smov [#allocation5]   ;;  %s629_s15 = int_to_ptr.vmem [resolvable:$true] %s628_s15 }
  0x2d   : > { %331 = vmatpush1.msra.mxu0 %v267_v8  ;;  %752 = vmatprep.subr.mxu1 %v923_v0  ;;  %s854_s25 = scalar_lea.vmem %s629_s15, 128  ;;  %s858_s22 = sshll.u32 %s926_s26, 4  ;;  %s859_s22 = int_to_ptr.vmem [resolvable:$false] %s858_s22 }
  0x2e   : > { %729 = vmatmul.mubr.msk.f32.vlgmr.msra.gmra.mxu0 %vm296_vm0, %v266_v9  ;;  %757 = vmatprep.subr.mxu0 %v923_v0  ;;  %v449_v29 = vrot.slane %v444_v28, %v283_v12  ;;  %p855_p6 = scmp.ne.s32.totalorder %s629_s15, %s854_s25  ;;  %s860_s30 = scalar_lea.vmem %s859_s22, 256 }
  0x2f   : > { %759 = vmatprep.mubr.msk.f32.mxu0 %vm924_vm1, %v923_v0  ;;  %753 = vmatpush3.msra.mxu1 %v269_v25  ;;  %p861_p11 = scmp.lt.s32.totalorder %s629_s15, %s859_s22  ;;  %p862_p12 = scmp.lt.s32.totalorder %s860_s30, %s854_s25 }
  0x30   : > { %755 = vmatmul.mubr.msk.f32.vlgmr.msra.gmra.mxu1 %vm296_vm0, %v266_v9  ;;  %762 = vmatprep.subr.mxu1 %v923_v0  ;;  %p856_p9 = pnand %p855_p6, %p995_p5 }
  0x31   : > { %764 = vmatprep.mubr.msk.f32.mxu1 %vm924_vm1, %v923_v0  ;;  %823 = vset.pattern.permute.xlu0 %v925_v44  ;;  %p863_p13 = por %p862_p12, %p861_p11 }
  0x32   : > { %609 = vperm.xlu1 %822, %v606_v45   ;;  %p857_p10 = pneg %p856_p9 }
  0x34   : > { %p864_p0 = pnand %p863_p13, %p857_p10 }
  0xad   : > { %v610_v49 = vpop.permute.xlu1 %609 }
  0xee   : > { %v366_v17 = vpop.f32.mrf.mxu0 }
  0xef   : > { %v367_v18 = vadd.f32 %v366_v17, %v284_v15 }
  0xf0   : > { %v368_v19 = vpop.f32.mrf.mxu0  ;;  %v437_v40 = vpop.f32.mrf.mxu1 }
  0xf1   : > { %v369_v20 = vadd.f32 %v368_v19, %v288_v16  ;;  %v441_v21 = vmul.f32 0.17677669, %v367_v18  ;;  %v438_v43 = vadd.f32 %v437_v40, %v292_v41 }
  0xf2   : > { %v756_v42 = vpop.f32.mrf.mxu1 }
  0xf3   : > { %758 = vmatpush3.xpose.msra.mxu0 %v369_v20  ;;  %763 = vmatpush3.msra.mxu1 %v438_v43 }
  0xf6   : > { %760 = vmatmul.mubr.f32.vlgmr.msra.gmra.mxu0 %v441_v21 }
 0x1b6   : > { %v517_v30 = vpop.f32.mrf.mxu0 }
 0x1b7   : > { %v518_v31 = vadd.f32 %v517_v30, %v449_v29 }
 0x1b8   : > { %v761_v32 = vpop.f32.mrf.mxu0 }
 0x1b9   : > { %v522_v33 = vsel %vm521_vm2, %v518_v31, -inf }
 0x1ba   : > { %523 = vmax.xlane.f32.xlu0 %v522_v33 }
 0x243   : > { %v524_v34 = vpop.xlane.xlu0 %523 }
 0x244   : > { %v525_v35 = vsub.f32 %v518_v31, %v524_v34 }
 0x246   : > { %v526_v36 = vmul.f32 1.442695, %v525_v35 }
 0x248   : > { %824 = vpow2.f32 %v526_v36 }
 0x255   : > { %v825_v37 = vpop.eup %824 }
 0x256   : > { %v528_v38 = vsel %vm521_vm2, %v825_v37, 0.0 }
 0x257   : > { %529 = vadd.xlane.f32.xlu0 %v528_v38 }
 0x2e0   : > { %v530_v46 = vpop.xlane.xlu0 %529 }
 0x2e1   : > { %826 = vrcp.f32 %v530_v46 }
 0x2ee   : > { %v827_v47 = vpop.eup %826 }
 0x2ef   : > { %v532_v48 = vmul.f32 %v827_v47, %v825_v37 }
 0x2f1   : > { %765 = vmatmul.mubr.msk.f32.vlgmr.msra.gmra.mxu1 %vm521_vm2, %v532_v48 }
 0x3b1   : > { %v602_v50 = vpop.f32.mrf.mxu1 }
 0x3b2   : > { %v612_v51 = vmul.f32 %v610_v49, %v602_v50 }
 0x3b3   : > { %v766_v52 = vpop.f32.mrf.mxu1 }
 0x3b4   : > { %613 = vst [vmem:[%s254_s13] sm:$0xff] %v612_v51 }
 0x3b5   : > { %867 = shalt.err (!%p864_p0)
}
 0x3b6   : > { %s868_s6 = scalar_lea.hbm %s1058_s17, 128  ;;  %s872_s9 = scalar_lea.hbm %s1098_s5, 256 }
 0x3b7   : > { %p869_p1 = scmp.ne.s32.totalorder %s1058_s17, %s868_s6  ;;  %p873_p4 = scmp.lt.s32.totalorder %s1058_s17, %s1098_s5 }
 0x3b8   : > { %p874_p7 = scmp.lt.s32.totalorder %s872_s9, %s868_s6 }
 0x3b9   : > { %p870_p2 = pnand %p869_p1, %p995_p5 }
 0x3ba   : > { %p875_p8 = por %p874_p7, %p873_p4 }
 0x3bb   : > { %p871_p3 = pneg %p870_p2 }
 0x3bd   : > { %p876_p6 = pnand %p875_p8, %p871_p3 }
 0x3bf   : > { %879 = shalt.err (!%p876_p6)
}
 0x3c0   : > { %771 = dma.vmem_to_hbm [thread:$0]  (%p995_p5), %s629_s15, 128, %s1058_s17, %s615_s23  }
 0x3c1 PF: > { %p783_p9 = scmp.ge.s32.totalorder %s918_s21, 2  ;;  %s640_s12 = sand.u32 1, %s906_s18  }
 0x3c2   : > { %p1102_p10 = scmp.ne.s32.totalorder %s1100_s29, 0  ;;  %s641_s13 = scalar_lea.sflag [#allocation4], %s640_s12 }
 0x3c4   : > { %p778_p11 = pnand %p783_p9, %p1102_p10 }
 0x3c6   : > { %p779_p12 = pneg %p778_p11 }
 0x3c8   : > { %901 = dma.done.wait (%p779_p12), %s641_s13, 128  }
 0x3c9   : > { %903 = vsyncadd (%p779_p12), %s641_s13, 4294967168  ;;  %p16_p13 = scmp.ge.s32.totalorder %s982_s24, 4   ;;  %s1103_s18 = smov %s910_s19 }
 0x3ca   : > { %s1104_s19 = smov %s914_s20  ;;  %s1105_s20 = smov %s993_s27 }
 0x3cb   : > { %s1106_s21 = smov %s982_s24  ;;  %18 = sbr.rel (!%p16_p13) target bundleno = 4 (0x4), region = 86 }
 0x3d0   :  { %646 = vsyncpa [#allocation3], 1 }
 0x3d1   :  { %648 = vsyncpa [#allocation3 + $0x1], 1 }
 0x3d2   :  { %649 = vsyncpa [#allocation4], 1 }
 0x3d3   :  { %651 = vsyncpa [#allocation4 + $0x1], 1 }

</bundles_post_ra>
